<compile_context>
chip_gen: v6e
topology: v6e:2x2x1
jax: 0.10.0
libtpu: 0.0.40
codegen_flags: <defaults>
</compile_context>

<pallas_src>
from functools import partial

import jax
import jax.numpy as jnp
from jax.experimental import pallas as pl
from jax.experimental.pallas import tpu as pltpu


def _ce2d_kernel(x_ref, t_ref, w_ref, out_ref, *, ignore_index, hw, tn):
    j = pl.program_id(1)                               # pixel-block index

    x = x_ref[0].astype(jnp.float32)                   # (C, TN) logits
    t = t_ref[0]                                       # (1, TN) int32 targets
    w = w_ref[...].astype(jnp.float32)                 # (C, 1)  class weights

    c = x.shape[0]

    # Numerically stable log-sum-exp along the class (sublane) axis.
    m = jnp.max(x, axis=0, keepdims=True)                                  # (1, TN)
    lse = m + jnp.log(jnp.sum(jnp.exp(x - m), axis=0, keepdims=True))      # (1, TN)

    # One-hot gather of the target logit and its class weight (C is small,
    # sits on the sublane axis -> cross-sublane reduce on the XLU).
    class_ids = jax.lax.broadcasted_iota(jnp.int32, (c, tn), 0)
    onehot = class_ids == t                                                # (C, TN)
    picked_x = jnp.sum(jnp.where(onehot, x, 0.0), axis=0, keepdims=True)   # (1, TN)
    w_t = jnp.sum(jnp.where(onehot, w, 0.0), axis=0, keepdims=True)        # (1, TN)
    picked_logp = picked_x - lse                                           # (1, TN)

    # Mask out-of-range (ragged last tile) pixels and ignored pixels with a
    # select (NOT a multiply) so garbage tail data cannot propagate NaN/Inf.
    lane = jax.lax.broadcasted_iota(jnp.int32, (1, tn), 1)
    in_bounds = (j * tn + lane) < hw
    valid = in_bounds & (t != ignore_index)

    num_p = jnp.sum(jnp.where(valid, w_t * (-picked_logp), 0.0))           # scalar
    den_p = jnp.sum(jnp.where(valid, w_t, 0.0))                            # scalar

    # Pack both partials into one lane-dense (8,128) slab (one output DMA per
    # grid step): num in sublanes 0-3, den in sublanes 4-7.  The wrapper reads
    # [..., 0, 0] and [..., 4, 0].
    sub = jax.lax.broadcasted_iota(jnp.int32, (8, 128), 0)
    slab = jnp.where(sub < 4, num_p, den_p)
    out_ref[...] = slab.reshape(out_ref.shape)


def cross_entropy_loss_2d(inputs, targets, weight, *, ignore_index=255,
                          tn_max=32768):
    """inputs: (N, C, H, W) float (any dtype); targets: (N, H, W) int;
    weight: (C,) float.  Returns scalar weighted mean NLL of
    log_softmax(inputs, dim=1) ignoring pixels with target == ignore_index."""
    N, C, H, W = inputs.shape
    HW = H * W

    # Pure reshapes (contiguous) -- no transpose, no padding, no dtype change.
    x = inputs.reshape(N, C, HW)
    t = targets.reshape(N, 1, HW).astype(jnp.int32)
    w = weight.reshape(C, 1).astype(jnp.float32)

    # Pick the pixel tile size: as large as possible within a conservative
    # VMEM budget (double-buffered inputs + in-kernel f32 temporaries).
    itemsize = jnp.dtype(x.dtype).itemsize
    budget = 20 * 1024 * 1024
    per_px = 2 * (C * itemsize + 4) + 16 * C + 16
    tn_cap = max(128, (budget // per_px) // 128 * 128)
    tn_eff = max(128, min(tn_max, tn_cap))
    # Full-extent block if the image fits in one tile (legal for any HW);
    # otherwise a multiple-of-128 tile with in-kernel tail masking.
    tn = HW if HW <= tn_eff else tn_eff
    nblocks = pl.cdiv(HW, tn)

    out_shape = jax.ShapeDtypeStruct((N, nblocks, 8, 128), jnp.float32)
    kernel = partial(_ce2d_kernel, ignore_index=ignore_index, hw=HW, tn=tn)

    parts = pl.pallas_call(
        kernel,
        out_shape=out_shape,
        grid_spec=pltpu.PrefetchScalarGridSpec(
            num_scalar_prefetch=0,
            grid=(N, nblocks),
            in_specs=[
                pl.BlockSpec((1, C, tn), lambda n, j: (n, 0, j)),   # logits
                pl.BlockSpec((1, 1, tn), lambda n, j: (n, 0, j)),   # targets
                pl.BlockSpec((C, 1), lambda n, j: (0, 0)),          # weights
            ],
            out_specs=pl.BlockSpec((1, 1, 8, 128), lambda n, j: (n, j, 0, 0)),
        ),
        compiler_params=pltpu.CompilerParams(
            dimension_semantics=("parallel", "parallel"),
            vmem_limit_bytes=32 * 1024 * 1024,
        ),
    )(x, t, w)

    num = jnp.sum(parts[:, :, 0, 0])
    den = jnp.sum(parts[:, :, 4, 0])
    # TODO(synk): den == 0 (all pixels ignored) yields NaN, matching PyTorch.
    return num / den


def _reference_loss(inputs, targets, weight, ignore_index=255):
    # Pure-JAX reference mirroring PyTorch semantics.
    logp = jax.nn.log_softmax(inputs.astype(jnp.float32), axis=1)  # (N,C,H,W)
    t = targets.astype(jnp.int32)
    valid = (t != ignore_index)
    t_safe = jnp.where(valid, t, 0)
    picked = jnp.take_along_axis(logp, t_safe[:, None, :, :], axis=1)[:, 0]
    w_t = weight[t_safe]
    vm = valid.astype(jnp.float32)
    num = jnp.sum(vm * w_t * (-picked))
    den = jnp.sum(vm * w_t)
    return num / den


if __name__ == "__main__":
    key = jax.random.PRNGKey(0)
    k1, k2, k3, k4 = jax.random.split(key, 4)

    N, C, H, W = 2, 4, 16, 16
    inputs = jax.random.normal(k1, (N, C, H, W), dtype=jnp.float32)
    targets = jax.random.randint(k2, (N, H, W), 0, C, dtype=jnp.int32)
    # Sprinkle in some ignore_index pixels.
    ignore_mask = jax.random.uniform(k3, (N, H, W)) < 0.1
    targets = jnp.where(ignore_mask, 255, targets)
    weight = jax.random.uniform(k4, (C,), minval=0.5, maxval=1.5,
                                dtype=jnp.float32)

    loss = cross_entropy_loss_2d(inputs, targets, weight, ignore_index=255)
    loss = jax.block_until_ready(loss)

    ref = jax.block_until_ready(_reference_loss(inputs, targets, weight, 255))
    assert jnp.allclose(loss, ref, rtol=1e-5, atol=1e-5), (loss, ref)

    print("KERNEL_OK")
</pallas_src>

<mosaic_0001>
module attributes {stable_mosaic.version = 11 : i64} {
  func.func @_ce2d_kernel(%arg0: i32, %arg1: i32, %arg2: memref<1x4x256xf32, #tpu.memory_space<vmem>>, %arg3: memref<1x1x256xi32, #tpu.memory_space<vmem>>, %arg4: memref<4x1xf32, #tpu.memory_space<vmem>>, %arg5: memref<1x1x8x128xf32, #tpu.memory_space<vmem>>) attributes {dimension_semantics = [#tpu.dimension_semantics<parallel>, #tpu.dimension_semantics<parallel>], iteration_bounds = array<i64: 2, 1>, scalar_prefetch = 0 : i64, scratch_operands = 0 : i64, tpu.core_type = #tpu.core_type<tc>, window_params = [{transform_indices = @transform_0, window_bounds = array<i64: 1, 4, 256>}, {transform_indices = @transform_1, window_bounds = array<i64: 1, 1, 256>}, {pipeline_mode = #tpu.pipeline_mode<synchronous>, transform_indices = @transform_2, window_bounds = array<i64: 4, 1>}, {transform_indices = @transform_3, window_bounds = array<i64: 1, 1, 8, 128>}]} {
    %c0 = arith.constant 0 : index
    %c0_0 = arith.constant 0 : index
    %c0_1 = arith.constant 0 : index
    %0 = vector.load %arg2[%c0, %c0_0, %c0_1] : memref<1x4x256xf32, #tpu.memory_space<vmem>>, vector<1x4x256xf32>
    %1 = vector.shape_cast %0 : vector<1x4x256xf32> to vector<4x256xf32>
    %c0_2 = arith.constant 0 : index
    %c0_3 = arith.constant 0 : index
    %c0_4 = arith.constant 0 : index
    %2 = vector.load %arg3[%c0_2, %c0_3, %c0_4] : memref<1x1x256xi32, #tpu.memory_space<vmem>>, vector<1x1x256xi32>
    %3 = vector.shape_cast %2 : vector<1x1x256xi32> to vector<1x256xi32>
    %c0_5 = arith.constant 0 : index
    %c0_6 = arith.constant 0 : index
    %4 = vector.load %arg4[%c0_5, %c0_6] : memref<4x1xf32, #tpu.memory_space<vmem>>, vector<4x1xf32>
    %cst = arith.constant dense<0xFF800000> : vector<256xf32>
    %5 = vector.multi_reduction <maximumf>, %1, %cst [0] : vector<4x256xf32> to vector<256xf32>
    %6 = vector.shape_cast %5 : vector<256xf32> to vector<1x256xf32>
    %7 = vector.broadcast %6 : vector<1x256xf32> to vector<4x256xf32>
    %8 = arith.subf %1, %7 : vector<4x256xf32>
    %9 = math.exp %8 : vector<4x256xf32>
    %cst_7 = arith.constant dense<0.000000e+00> : vector<256xf32>
    %10 = vector.multi_reduction <add>, %9, %cst_7 [0] : vector<4x256xf32> to vector<256xf32>
    %11 = vector.shape_cast %10 : vector<256xf32> to vector<1x256xf32>
    %12 = math.log %11 : vector<1x256xf32>
    %13 = arith.addf %6, %12 : vector<1x256xf32>
    %14 = tpu.iota {dimensions = array<i32: 0>} : vector<4x256xi32>
    %15 = vector.broadcast %3 : vector<1x256xi32> to vector<4x256xi32>
    %16 = arith.cmpi eq, %14, %15 : vector<4x256xi32>
    %cst_8 = arith.constant 0.000000e+00 : f32
    %17 = vector.broadcast %cst_8 : f32 to vector<4x256xf32>
    %18 = arith.select %16, %1, %17 : vector<4x256xi1>, vector<4x256xf32>
    %cst_9 = arith.constant dense<0.000000e+00> : vector<256xf32>
    %19 = vector.multi_reduction <add>, %18, %cst_9 [0] : vector<4x256xf32> to vector<256xf32>
    %20 = vector.shape_cast %19 : vector<256xf32> to vector<1x256xf32>
    %cst_10 = arith.constant 0.000000e+00 : f32
    %21 = vector.shape_cast %4 : vector<4x1xf32> to vector<4x1xf32>
    %22 = vector.broadcast %21 : vector<4x1xf32> to vector<4x256xf32>
    %23 = vector.broadcast %cst_10 : f32 to vector<4x256xf32>
    %24 = arith.select %16, %22, %23 : vector<4x256xi1>, vector<4x256xf32>
    %cst_11 = arith.constant dense<0.000000e+00> : vector<256xf32>
    %25 = vector.multi_reduction <add>, %24, %cst_11 [0] : vector<4x256xf32> to vector<256xf32>
    %26 = vector.shape_cast %25 : vector<256xf32> to vector<1x256xf32>
    %27 = arith.subf %20, %13 : vector<1x256xf32>
    %28 = tpu.iota {dimensions = array<i32: 1>} : vector<1x256xi32>
    %c256_i32 = arith.constant 256 : i32
    %29 = arith.muli %arg1, %c256_i32 : i32
    %30 = vector.broadcast %29 : i32 to vector<1x256xi32>
    %31 = arith.addi %30, %28 : vector<1x256xi32>
    %c256_i32_12 = arith.constant 256 : i32
    %32 = vector.broadcast %c256_i32_12 : i32 to vector<1x256xi32>
    %33 = arith.cmpi slt, %31, %32 : vector<1x256xi32>
    %c255_i32 = arith.constant 255 : i32
    %34 = vector.broadcast %c255_i32 : i32 to vector<1x256xi32>
    %35 = arith.cmpi ne, %3, %34 : vector<1x256xi32>
    %36 = arith.andi %33, %35 : vector<1x256xi1>
    %cst_13 = arith.constant 0.000000e+00 : f32
    %37 = vector.broadcast %cst_13 : f32 to vector<1x256xf32>
    %38 = arith.subf %37, %27 : vector<1x256xf32>
    %39 = arith.mulf %26, %38 : vector<1x256xf32>
    %cst_14 = arith.constant 0.000000e+00 : f32
    %40 = vector.broadcast %cst_14 : f32 to vector<1x256xf32>
    %41 = arith.select %36, %39, %40 : vector<1x256xi1>, vector<1x256xf32>
    %42 = vector.shape_cast %41 : vector<1x256xf32> to vector<1x1x256xf32>
    %cst_15 = arith.constant dense<0.000000e+00> : vector<1xf32>
    %43 = vector.multi_reduction <add>, %42, %cst_15 [1, 2] : vector<1x1x256xf32> to vector<1xf32>
    %44 = vector.shape_cast %43 : vector<1xf32> to vector<1x1x1xf32>
    %45 = vector.extract %44[0, 0, 0] : f32 from vector<1x1x1xf32>
    %cst_16 = arith.constant 0.000000e+00 : f32
    %46 = vector.broadcast %cst_16 : f32 to vector<1x256xf32>
    %47 = arith.select %36, %26, %46 : vector<1x256xi1>, vector<1x256xf32>
    %48 = vector.shape_cast %47 : vector<1x256xf32> to vector<1x1x256xf32>
    %cst_17 = arith.constant dense<0.000000e+00> : vector<1xf32>
    %49 = vector.multi_reduction <add>, %48, %cst_17 [1, 2] : vector<1x1x256xf32> to vector<1xf32>
    %50 = vector.shape_cast %49 : vector<1xf32> to vector<1x1x1xf32>
    %51 = vector.extract %50[0, 0, 0] : f32 from vector<1x1x1xf32>
    %52 = tpu.iota {dimensions = array<i32: 0>} : vector<8x128xi32>
    %c4_i32 = arith.constant 4 : i32
    %53 = vector.broadcast %c4_i32 : i32 to vector<8x128xi32>
    %54 = arith.cmpi slt, %52, %53 : vector<8x128xi32>
    %55 = vector.broadcast %45 : f32 to vector<8x128xf32>
    %56 = vector.broadcast %51 : f32 to vector<8x128xf32>
    %57 = arith.select %54, %55, %56 : vector<8x128xi1>, vector<8x128xf32>
    %58 = vector.shape_cast %57 : vector<8x128xf32> to vector<1x1x8x128xf32>
    %c0_18 = arith.constant 0 : index
    %c0_19 = arith.constant 0 : index
    %c0_20 = arith.constant 0 : index
    %c0_21 = arith.constant 0 : index
    %59 = vector.load %arg5[%c0_18, %c0_19, %c0_20, %c0_21] : memref<1x1x8x128xf32, #tpu.memory_space<vmem>>, vector<1x1x8x128xf32>
    tpu.vector_store %arg5[%c0_18, %c0_19, %c0_20, %c0_21], %58 {strides = array<i32>} : memref<1x1x8x128xf32, #tpu.memory_space<vmem>>, vector<1x1x8x128xf32>,
    return
  }
  func.func @transform_0(%arg0: i32, %arg1: i32) -> (i32, i32, i32) {
    %c0_i32 = arith.constant 0 : i32
    %c0_i32_0 = arith.constant 0 : i32
    return %arg0, %c0_i32, %arg1 : i32, i32, i32
  }
  func.func @transform_1(%arg0: i32, %arg1: i32) -> (i32, i32, i32) {
    %c0_i32 = arith.constant 0 : i32
    %c0_i32_0 = arith.constant 0 : i32
    return %arg0, %c0_i32, %arg1 : i32, i32, i32
  }
  func.func @transform_2(%arg0: i32, %arg1: i32) -> (i32, i32) {
    %c0_i32 = arith.constant 0 : i32
    %c0_i32_0 = arith.constant 0 : i32
    %c0_i32_1 = arith.constant 0 : i32
    return %c0_i32, %c0_i32_0 : i32, i32
  }
  func.func @transform_3(%arg0: i32, %arg1: i32) -> (i32, i32, i32, i32) {
    %c0_i32 = arith.constant 0 : i32
    %c0_i32_0 = arith.constant 0 : i32
    %c0_i32_1 = arith.constant 0 : i32
    return %arg0, %arg1, %c0_i32, %c0_i32_0 : i32, i32, i32, i32
  }
}

</mosaic_0001>

<bundles_post_ra>
// kernel: tpu_custom_call.1
= control target key start
LH: loop header
LB: loop body
LE: loop exit
PB: predicated region body
PF: predicated region fallthrough
CT: control target
= control target key end

     0   :  { %8 = vsyncpa [#allocation3], 0  ;;  %s923_s0 = inlined_call_operand.hbm [shape: f32[2,4,256], index: 0, kind: input, shape index: {}]   ;;  %s924_s1 = inlined_call_operand.vmem [shape: s32[2,1,256], index: 1, kind: input, shape index: {}]   ;;  %s925_s2 = inlined_call_operand.vmem [shape: f32[4,1], index: 2, kind: input, shape index: {}]   ;;  %s926_s3 = inlined_call_operand.hbm [shape: f32[2,1,8,128], index: 3, kind: output, shape index: {}]  }
   0x1   :  { %10 = vsyncpa [#allocation3 + $0x1], 0 }
   0x2   :  { %11 = vsyncpa [#allocation4], 0 }
   0x3   :  { %13 = vsyncpa [#allocation4 + $0x1], 0  ;;  %s738_s12 = smov 0   ;;  %s740_s13 = smov 0  }
   0x4   :  { %s742_s14 = smov 0   ;;  %s744_s15 = smov 0  }
   0x5   :  { %s746_s16 = smov 0   ;;  %s748_s17 = smov 0  }
   0x6 LB: > { %s514_s18 = sadd.s32 4294967295, %s713_s17   ;;  %s515_s19 = sadd.s32 4294967294, %s713_s17   ;;  %s713_s17 = sphi %s748_s17, %s19_s17   ;;  %s709_s16 = sphi %s746_s16, %s938_s16   ;;  %s705_s15 = sphi %s744_s15, %s937_s15   ;;  %s701_s14 = sphi %s742_s14, %s936_s14   ;;  %s697_s13 = sphi %s740_s13, %s935_s13   ;;  %s693_s12 = sphi %s738_s12, %s934_s12  }
   0x7   : > { %s31_s20 = sadd.s32 1, %s709_s16  ;;  %s40_s21 = sadd.s32 1, %s701_s14 }
   0x8   : > { %p33_p0 = scmp.ge.s32.totalorder %s31_s20, 2  ;;  %p47_p1 = scmp.ne.s32.totalorder %s701_s14, %s697_s13 }
   0x9   : > { %p48_p2 = scmp.eq.s32.totalorder %s713_s17, 0  ;;  %p53_p3 = scmp.ne.s32.totalorder %s697_s13, %s693_s12 }
   0xa   : > { %s940_s20 = smov (%p33_p0, %s31_s20), 0  ;;  %p54_p5 = scmp.eq.s32.totalorder %s514_s18, 0 }
   0xb   : > { %p779_p4 = por %p48_p2, %p47_p1  ;;  %s35_s23 = ssub.s32 %s709_s16, %s940_s20 }
   0xc   : > { %p128_p6 = scmp.eq.s32.totalorder %s514_s18, 1  ;;  %p38_p7 = scmp.eq.s32.totalorder %s35_s23, 0 }
   0xd   : > { %p785_p8 = por %p54_p5, %p53_p3  ;;  %p134_p10 = scmp.eq.s32.totalorder %s515_s19, 1 }
   0xe   : > { %p789_p9 = por %p128_p6, %p47_p1  ;;  %p546_p13 = scmp.lt.s32.totalorder %s713_s17, 2 }
   0xf   : > { %s794_s26 = scalar_select %p38_p7, %s701_s14, %s40_s21  }
  0x10   : > { %p796_p11 = por %p134_p10, %p53_p3  ;;  %s157_s28 = sand.u32 1, %s701_s14  }
  0x11   : > { %s518_s29 = sshll.u32 %s157_s28, 3  ;;  %s529_s30 = sshll.u32 %s709_s16, 7 }
  0x12   : > { %s930_s27 = scalar_select %p796_p11, 1, 0 }
  0x13   : > { %s169_s6 = scalar_lea.hbm %s923_s0, %s529_s30  ;;  %s161_s7 = scalar_lea.vmem [#allocation2], %s518_s29 }
  0x14   : > { %s171_s8 = sshll.u32 %s161_s7, 4  ;;  %p809_p0 = pnand %p546_p13, %p779_p4  ;;  %s172_s8 = int_to_ptr.vmem [resolvable:$true] %s171_s8 }
  0x15   : > { %p521_p1 = scmp.ge.s32.totalorder %s713_s17, 1  ;;  %p188_p2 = scmp.lt.s32.totalorder %s713_s17, 3 }
  0x16   : > { %s158_s10 = scalar_lea.sflag [#allocation3], %s157_s28  ;;  %p607_p3 = pneg %p809_p0 }
  0x17   : > { %s618_s11 = scalar_lea.vmem %s172_s8, 128  ;;  %s715_s18 = smov [#allocation2]  }
  0x18   : > { %p619_p5 = scmp.ne.s32.totalorder %s172_s8, %s618_s11  ;;  %s623_s19 = sshll.u32 %s715_s18, 4  ;;  %s624_s19 = int_to_ptr.vmem [resolvable:$false] %s623_s19 }
  0x19   : > { %s625_s21 = scalar_lea.vmem %s624_s19, 256  ;;  %p626_p10 = scmp.lt.s32.totalorder %s172_s8, %s624_s19 }
  0x1a   : > { %p621_p6 = pnand %p619_p5, %p607_p3  ;;  %p627_p12 = scmp.lt.s32.totalorder %s625_s21, %s618_s11 }
  0x1c   : > { %p622_p7 = pneg %p621_p6  ;;  %p628_p4 = por %p627_p12, %p626_p10 }
  0x1e   : > { %p629_p13 = pnand %p628_p4, %p622_p7 }
  0x20   : > { %632 = shalt.err (!%p629_p13)
}
  0x21   : > { %541 = dma.hbm_to_vmem [thread:$0]  (!%p809_p0), %s169_s6, 128, %s172_s8, %s158_s10  }
  0x22   : > { %p189_p11 = pnand %p521_p1, %p188_p2 }
  0x23   : > { %s824_s22 = sand.u32 (!%p189_p11), 1, %s697_s13  }
  0x24   : > { %192 = sbr.rel (%p189_p11) target bundleno = 404 (0x194), region = 32  ;;  %s522_s23 = sshll.u32 (!%p189_p11), %s824_s22, 3 }
  0x25   : > { %s195_s28 = scalar_lea.sflag (!%p189_p11), [#allocation3], %s824_s22  ;;  %s198_s29 = scalar_lea.vmem (!%p189_p11), [#allocation2], %s522_s23 }
  0x29   : > { %684 = dma.done.wait (%p785_p8), %s195_s28, 128  }
  0x2a   : > { %686 = vsyncadd (%p785_p8), %s195_s28, 4294967168  ;;  %v716_v0 = vmov 0   ;;  %v241_v1 = vld [vmem:[%s925_s2] sm:$0xf]  ;;  %vm245_vm0 = vcmask 1043456   ;;  %p231_p8 = scmp.lt.s32.totalorder %s705_s15, 1  ;;  %v290_v25 = vlaneseq }
  0x2b   : > { %597 = vset.pattern.permute.xlu0 %v716_v0  ;;  %v239_v2 = vld [vmem:[%s198_s29] sm:$0xff]  ;;  %vm370_vm6 = vcmask 1040384   ;;  %s526_s9 = sshll.u32 %s705_s15, 7  ;;  %s228_s10 = scalar_lea.vmem [#allocation5], %s522_s23 }
  0x2c   : > { %320 = vperm.xlu0 %597, %v241_v1   ;;  %v243_v3 = vcombine.high %v239_v2, %v239_v2  ;;  %v246_v4 = vsel %vm245_vm0, %v239_v2, -inf  ;;  %s232_s24 = scalar_select %p231_p8, %s705_s15, 1  ;;  %v850_v28 = vshrl.u32 %v290_v25, 7 }
  0x2d   : > { %v247_v6 = vrot.slane %v246_v4, 4  ;;  %s417_s11 = sshll.u32 %s228_s10, 4  ;;  %s881_s29 = scalar_lea.hbm %s926_s3, %s526_s9  ;;  %s418_s11 = int_to_ptr.vmem [resolvable:$true] %s417_s11 }
  0x2e   : > { %v253_v5 = vsel %vm245_vm0, %v243_v3, -inf  ;;  %s524_s5 = sshll.u32 %s232_s24, 1  ;;  %v294_v31 = vsub.s32 0, %v850_v28  ;;  %v298_v32 = vsub.s32 1, %v850_v28  ;;  %vm397_vm7 = vcmp.lt.s32.totalorder %v850_v28, 4  ;;  %s403_s30 = scalar_lea.sflag [#allocation4], %s824_s22 }
  0x2f   : > { %v254_v7 = vrot.slane %v253_v5, 4  ;;  %v248_v8 = vmax.f32 %v246_v4, %v247_v6  ;;  %s237_s8 = scalar_lea.vmem %s924_s1, %s524_s5  ;;  %s633_s4 = scalar_lea.vmem %s418_s11, 128 }
  0x30   : > { %v240_v33 = vld [vmem:[%s237_s8] sm:$0x3]  ;;  %p634_p11 = scmp.ne.s32.totalorder %s418_s11, %s633_s4  ;;  %s717_s15 = smov [#allocation5]  }
  0x31   : > { %v255_v9 = vmax.f32 %v253_v5, %v254_v7  ;;  %v249_v10 = vrot.slane %v248_v8, 2  ;;  %v295_v36 = vrot.slane %v240_v33, %v294_v31  ;;  %v299_v37 = vrot.slane %v240_v33, %v298_v32  ;;  %s637_s23 = sshll.u32 %s717_s15, 4  ;;  %s638_s23 = int_to_ptr.vmem [resolvable:$false] %s637_s23 }
  0x32   : > { %vm350_vm3 = vcmp.ne.s32.totalorder %v240_v33, 255  ;;  %p635_p12 = pnand %p634_p11, %p789_p9  ;;  %s639_s24 = scalar_lea.vmem %s638_s23, 256 }
  0x33   : > { %v256_v11 = vrot.slane %v255_v9, 2  ;;  %v250_v12 = vmax.f32 %v248_v8, %v249_v10  ;;  %vm300_vm1 = vcmp.eq.s32.totalorder %v850_v28, %v295_v36  ;;  %vm301_vm2 = vcmp.eq.s32.totalorder %v850_v28, %v299_v37  ;;  %p640_p1 = scmp.lt.s32.totalorder %s418_s11, %s638_s23  ;;  %p641_p2 = scmp.lt.s32.totalorder %s639_s24, %s633_s4 }
  0x34   : > { %v302_v42 = vsel %vm300_vm1, %v239_v2, 0.0  ;;  %v303_v43 = vsel %vm301_vm2, %v243_v3, 0.0  ;;  %v351_v10 = vsel %vm350_vm3, 1, %v716_v0  ;;  %p636_p0 = pneg %p635_p12 }
  0x35   : > { %v257_v13 = vmax.f32 %v255_v9, %v256_v11  ;;  %v251_v14 = vrot.slane %v250_v12, 1  ;;  %v304_v45 = vsel %vm245_vm0, %v302_v42, 0.0  ;;  %v311_v46 = vsel %vm245_vm0, %v303_v43, 0.0  ;;  %p642_p3 = por %p641_p2, %p640_p1 }
  0x36   : > { %v305_v48 = vrot.slane %v304_v45, 4  ;;  %v312_v49 = vrot.slane %v311_v46, 4 }
  0x37   : > { %v258_v15 = vrot.slane %v257_v13, 1  ;;  %v840_v16 = vmax.f32 %v250_v12, %v251_v14  ;;  %p643_p5 = pnand %p642_p3, %p636_p0 }
  0x38   : > { %v306_v50 = vadd.f32 %v305_v48, %v304_v45  ;;  %v313_v51 = vadd.f32 %v312_v49, %v311_v46 }
  0x39   : > { %v842_v17 = vmax.f32 %v257_v13, %v258_v15 }
  0x3a   : > { %v307_v52 = vrot.slane %v306_v50, 2  ;;  %v314_v53 = vrot.slane %v313_v51, 2 }
  0x3b   : > { %v262_v18 = vcombine.low %v840_v16, %v842_v17 }
  0x3c   : > { %v308_v54 = vadd.f32 %v307_v52, %v306_v50  ;;  %v315_v55 = vadd.f32 %v314_v53, %v313_v51 }
  0x3d   : > { %v264_v19 = vsub.f32 %v239_v2, %v262_v18 }
  0x3e   : > { %v309_v58 = vrot.slane %v308_v54, 1  ;;  %v316_v59 = vrot.slane %v315_v55, 1 }
  0x3f   : > { %v265_v20 = vmul.f32 1.442695, %v264_v19  ;;  %v355_v19 = vrot.slane %v351_v10, %v294_v31 }
  0x40   : > { %v310_v2 = vadd.f32 %v309_v58, %v308_v54  ;;  %v317_v3 = vadd.f32 %v316_v59, %v315_v55 }
  0x41   : > { %599 = vpow2.f32 %v265_v20  ;;  %v359_v20 = vrot.slane %v351_v10, %v298_v32  ;;  %vm360_vm4 = vcmp.ne.s32.totalorder %v355_v19, 0 }
  0x43   : > { %vm361_vm5 = vcmp.ne.s32.totalorder %v359_v20, 0 }
  0x4e   : > { %v600_v21 = vpop.eup %599 }
  0x4f   : > { %v268_v22 = vcombine.high %v600_v21, %v600_v21  ;;  %v270_v23 = vsel %vm245_vm0, %v600_v21, 0.0 }
  0x50   : > { %v271_v26 = vrot.slane %v270_v23, 4 }
  0x51   : > { %v277_v24 = vsel %vm245_vm0, %v268_v22, 0.0 }
  0x52   : > { %v278_v27 = vrot.slane %v277_v24, 4  ;;  %v272_v29 = vadd.f32 %v271_v26, %v270_v23 }
  0x54   : > { %v279_v30 = vadd.f32 %v278_v27, %v277_v24  ;;  %v273_v34 = vrot.slane %v272_v29, 2 }
  0x56   : > { %v280_v35 = vrot.slane %v279_v30, 2  ;;  %v274_v38 = vadd.f32 %v273_v34, %v272_v29 }
  0x58   : > { %v281_v39 = vadd.f32 %v280_v35, %v279_v30  ;;  %v275_v40 = vrot.slane %v274_v38, 1 }
  0x5a   : > { %v282_v41 = vrot.slane %v281_v39, 1  ;;  %v276_v44 = vadd.f32 %v275_v40, %v274_v38 }
  0x5c   : > { %v283_v47 = vadd.f32 %v282_v41, %v281_v39  ;;  %601 = vlog2.f32 %v276_v44 }
  0x5e   : > { %603 = vlog2.f32 %v283_v47 }
  0x69   : > { %v602_v56 = vpop.eup %601 }
  0x6a   : > { %v285_v60 = vmul.f32 0.6931472, %v602_v56 }
  0x6b   : > { %v604_v57 = vpop.eup %603 }
  0x6c   : > { %v287_v61 = vmul.f32 0.6931472, %v604_v57  ;;  %v288_v8 = vadd.f32 %v285_v60, %v840_v16 }
  0x6e   : > { %v289_v9 = vadd.f32 %v287_v61, %v842_v17  ;;  %v339_v15 = vsub.f32 %v310_v2, %v288_v8 }
  0x70   : > { %v340_v18 = vsub.f32 %v317_v3, %v289_v9  ;;  %v364_v25 = vsub.f32 0.0, %v339_v15 }
  0x72   : > { %v365_v26 = vsub.f32 0.0, %v340_v18 }
  0xa7   : > { %v321_v62 = vpop.permute.xlu0 %320 }
  0xa8   : > { %v323_v63 = vsel %vm300_vm1, %v321_v62, 0.0  ;;  %v324_v1 = vsel %vm301_vm2, %v321_v62, 0.0 }
  0xa9   : > { %v325_v4 = vsel %vm245_vm0, %v323_v63, 0.0  ;;  %v332_v5 = vsel %vm245_vm0, %v324_v1, 0.0 }
  0xaa   : > { %v326_v6 = vrot.slane %v325_v4, 4  ;;  %v333_v7 = vrot.slane %v332_v5, 4 }
  0xac   : > { %v327_v11 = vadd.f32 %v326_v6, %v325_v4  ;;  %v334_v12 = vadd.f32 %v333_v7, %v332_v5 }
  0xae   : > { %v328_v13 = vrot.slane %v327_v11, 2  ;;  %v335_v14 = vrot.slane %v334_v12, 2 }
  0xb0   : > { %v329_v21 = vadd.f32 %v328_v13, %v327_v11  ;;  %v336_v22 = vadd.f32 %v335_v14, %v334_v12 }
  0xb2   : > { %v330_v23 = vrot.slane %v329_v21, 1  ;;  %v337_v24 = vrot.slane %v336_v22, 1 }
  0xb4   : > { %v331_v16 = vadd.f32 %v330_v23, %v329_v21  ;;  %v338_v17 = vadd.f32 %v337_v24, %v336_v22 }
  0xb6   : > { %v383_v0 = vsel %vm360_vm4, %v331_v16, 0.0  ;;  %v384_v27 = vsel %vm361_vm5, %v338_v17, 0.0  ;;  %v366_v29 = vmul.f32 %v364_v25, %v331_v16  ;;  %v367_v30 = vmul.f32 %v365_v26, %v338_v17 }
  0xb7   : > { %v385_v33 = vsel %vm370_vm6, %v383_v0, 0.0  ;;  %v386_v34 = vsel %vm370_vm6, %v384_v27, 0.0 }
  0xb8   : > { %v387_v35 = vadd.f32 %v386_v34, %v385_v33  ;;  %v368_v31 = vsel %vm360_vm4, %v366_v29, 0.0  ;;  %v369_v32 = vsel %vm361_vm5, %v367_v30, 0.0 }
  0xb9   : > { %v371_v36 = vsel %vm370_vm6, %v368_v31, 0.0  ;;  %v372_v37 = vsel %vm370_vm6, %v369_v32, 0.0 }
  0xba   : > { %388 = vadd.xlane.f32.xlu1 %v387_v35  ;;  %v373_v38 = vadd.f32 %v372_v37, %v371_v36 }
  0xbc   : > { %374 = vadd.xlane.f32.xlu0 %v373_v38 }
 0x143   : > { %v389_v39 = vpop.xlane.xlu1 %388 }
 0x144   : > { %v390_v40 = vrot.slane %v389_v39, 4 }
 0x145   : > { %v375_v41 = vpop.xlane.xlu0 %374 }
 0x146   : > { %v391_v42 = vadd.f32 %v390_v40, %v389_v39  ;;  %v376_v43 = vrot.slane %v375_v41, 4 }
 0x148   : > { %v392_v44 = vrot.slane %v391_v42, 2  ;;  %v377_v45 = vadd.f32 %v376_v43, %v375_v41 }
 0x14a   : > { %v393_v46 = vadd.f32 %v392_v44, %v391_v42  ;;  %v378_v47 = vrot.slane %v377_v45, 2 }
 0x14c   : > { %v379_v48 = vadd.f32 %v378_v47, %v377_v45  ;;  %v394_v49 = vrot.slane %v393_v46, 1 }
 0x14e   : > { %v380_v50 = vrot.slane %v379_v48, 1  ;;  %v395_v52 = vadd.f32 %v394_v49, %v393_v46 }
 0x150   : > { %v381_v51 = vadd.f32 %v380_v50, %v379_v48 }
 0x152   : > { %530 = vpush %v381_v51 }
 0x153   : > { %532 = vpush %v395_v52 }
 0x183   : > { %s531_s18 = spop %530 }
 0x184   : > { %v398_v53 = vstv %s531_s18  ;;  %s533_s19 = spop %532 }
 0x185   : > { %v399_v54 = vstv %s533_s19 }
 0x186   : > { %v400_v55 = vsel %vm397_vm7, %v398_v53, %v399_v54 }
 0x187   : > { %401 = vst [vmem:[%s228_s10] sm:$0xff] %v400_v55 }
 0x188   : > { %646 = shalt.err (!%p643_p5)
}
 0x189   : > { %s647_s5 = scalar_lea.hbm %s881_s29, 128  ;;  %s651_s7 = scalar_lea.hbm %s926_s3, 256 }
 0x18a   : > { %p648_p6 = scmp.ne.s32.totalorder %s881_s29, %s647_s5  ;;  %p652_p4 = scmp.lt.s32.totalorder %s881_s29, %s926_s3 }
 0x18b   : > { %p653_p13 = scmp.lt.s32.totalorder %s651_s7, %s647_s5 }
 0x18c   : > { %p649_p7 = pnand %p648_p6, %p789_p9 }
 0x18d   : > { %p654_p8 = por %p653_p13, %p652_p4 }
 0x18e   : > { %p650_p10 = pneg %p649_p7 }
 0x190   : > { %p655_p11 = pnand %p654_p8, %p650_p10 }
 0x192   : > { %658 = shalt.err (!%p655_p11)
}
 0x193   : > { %536 = dma.vmem_to_hbm [thread:$0]  (%p789_p9), %s418_s11, 128, %s881_s29, %s403_s30  }
 0x194 PF: > { %s429_s10 = sand.u32 1, %s693_s12   ;;  %p932_p12 = scmp.ne.s32.totalorder %s930_s27, 0 }
 0x195   : > { %p933_p0 = scmp.ge.s32.totalorder %s713_s17, 2  ;;  %s430_s18 = scalar_lea.sflag [#allocation4], %s429_s10 }
 0x197   : > { %p543_p1 = pnand %p933_p0, %p932_p12 }
 0x199   : > { %p544_p2 = pneg %p543_p1 }
 0x19b   : > { %688 = dma.done.wait (%p544_p2), %s430_s18, 128  }
 0x19c   : > { %690 = vsyncadd (%p544_p2), %s430_s18, 4294967168  ;;  %s19_s17 = sadd.s32 1, %s713_s17   ;;  %s934_s12 = smov %s697_s13 }
 0x19d   : > { %p16_p3 = scmp.ge.s32.totalorder %s19_s17, 4   ;;  %s935_s13 = smov %s701_s14 }
 0x19e   : > { %s936_s14 = smov %s794_s26  ;;  %s937_s15 = smov %s709_s16 }
 0x19f   : > { %s938_s16 = smov %s940_s20  ;;  %18 = sbr.rel (!%p16_p3) target bundleno = 6 (0x6), region = 80 }
 0x1a4   :  { %435 = vsyncpa [#allocation3], 1 }
 0x1a5   :  { %437 = vsyncpa [#allocation3 + $0x1], 1 }
 0x1a6   :  { %438 = vsyncpa [#allocation4], 1 }
 0x1a7   :  { %440 = vsyncpa [#allocation4 + $0x1], 1 }

</bundles_post_ra>
